<compile_context>
chip_gen: v7x
topology: tpu7x:2x2x1
jax: 0.10.0
libtpu: 0.0.40
codegen_flags: <defaults>
</compile_context>

<pallas_src>
import functools
import math

import jax
import jax.numpy as jnp
from jax.experimental import pallas as pl
from jax.experimental.pallas import tpu as pltpu


def _layernorm(x, gamma, beta, eps=1e-5):
    # x: [N, D] fp32 ; gamma/beta: [1, D]
    mu = jnp.mean(x, axis=-1, keepdims=True)
    xc = x - mu
    var = jnp.mean(xc * xc, axis=-1, keepdims=True)
    return xc * jax.lax.rsqrt(var + eps) * gamma + beta


def _block_kernel(x_ref,
                  ln1_g_ref, ln1_b_ref,
                  w_in_ref, b_in_ref,
                  w_out_ref, b_out_ref,
                  ln2_g_ref, ln2_b_ref,
                  w_fc_ref, b_fc_ref,
                  w_proj_ref, b_proj_ref,
                  o_ref,
                  *, d_model, n_head, bt, seq, matmul_dtype):
    head_dim = d_model // n_head
    n_rows = bt * seq

    # [bt, S, D] -> [bt*S, D] : merge leading dims (layout-preserving).
    x = x_ref[...].reshape(n_rows, d_model).astype(jnp.float32)

    # ---- ln_1 + multi-head self-attention ----
    h = _layernorm(x, ln1_g_ref[...], ln1_b_ref[...])

    # One MXU-dense QKV projection over all bt*S rows.
    # (1/sqrt(head_dim) is already folded into the Q columns of w_in / b_in.)
    qkv = jnp.dot(h.astype(matmul_dtype), w_in_ref[...],
                  preferred_element_type=jnp.float32) + b_in_ref[...]

    attn_acc = jnp.zeros((n_rows, d_model), jnp.float32)
    for hi in range(n_head):
        lo = hi * head_dim
        qh = qkv[:, 0 * d_model + lo: 0 * d_model + lo + head_dim]
        kh = qkv[:, 1 * d_model + lo: 1 * d_model + lo + head_dim]
        vh = qkv[:, 2 * d_model + lo: 2 * d_model + lo + head_dim]
        # batch the bt sequences: [bt, S, hd]
        qh = qh.reshape(bt, seq, head_dim).astype(matmul_dtype)
        kh = kh.reshape(bt, seq, head_dim).astype(matmul_dtype)
        vh = vh.reshape(bt, seq, head_dim).astype(matmul_dtype)

        s = jnp.einsum("bqe,bke->bqk", qh, kh,
                       preferred_element_type=jnp.float32)      # [bt, S, S]
        s = s - jnp.max(s, axis=-1, keepdims=True)
        p = jnp.exp(s)
        p = p * pl.reciprocal(jnp.sum(p, axis=-1, keepdims=True), approx=True)
        oh = jnp.einsum("bqk,bke->bqe", p.astype(matmul_dtype), vh,
                        preferred_element_type=jnp.float32)      # [bt, S, hd]

        # Fold this head's out-projection straight into the accumulator:
        # no per-head concat / lane relayout.
        attn_acc = attn_acc + jnp.dot(
            oh.reshape(n_rows, head_dim).astype(matmul_dtype),
            w_out_ref[hi],                                        # [hd, D]
            preferred_element_type=jnp.float32)

    x1 = x + attn_acc + b_out_ref[...]

    # ---- ln_2 + MLP (c_fc -> QuickGELU -> c_proj) ----
    h2 = _layernorm(x1, ln2_g_ref[...], ln2_b_ref[...])
    fc = jnp.dot(h2.astype(matmul_dtype), w_fc_ref[...],
                 preferred_element_type=jnp.float32) + b_fc_ref[...]
    fc = fc * jax.nn.sigmoid(1.702 * fc)                          # QuickGELU
    proj = jnp.dot(fc.astype(matmul_dtype), w_proj_ref[...],
                   preferred_element_type=jnp.float32) + b_proj_ref[...]

    o_ref[...] = (x1 + proj).reshape(bt, seq, d_model).astype(o_ref.dtype)


def _pick_batch_tile(batch, seq, target_rows=256, max_rows=2048):
    """Smallest divisor bt of `batch` such that bt*seq fills the MXU M-dim."""
    divisors = [d for d in range(1, batch + 1) if batch % d == 0]
    best = divisors[0]
    for d in divisors:
        if d * seq > max_rows:
            break
        best = d
        if d * seq >= target_rows:
            break
    return best


def _vmem_limit_bytes(bt, seq, d_model, weight_itemsize, x_itemsize):
    d4 = 4 * d_model
    # weights may be double-buffered by the implicit pipeline even with constant
    # index maps, so budget 2x.
    weights = 2 * (d_model * 3 * d_model + d_model * d_model
                   + d_model * d4 + d4 * d_model) * weight_itemsize
    biases = 2 * (3 * d_model + 6 * d_model + d4) * 4
    io = 2 * 2 * bt * seq * d_model * x_itemsize                  # x + out, 2-buffered
    acts = bt * seq * (3 * d_model + d4 + 6 * d_model) * 4        # qkv / fc / temps
    total = int(1.4 * (weights + biases + io + acts)) + (4 << 20)
    # Cap at 64 MiB so the request stays within v7x physical VMEM per TensorCore.
    return int(max(32 << 20, min(total, 64 << 20)))


def residual_attention_block(x, params, *, n_head, matmul_dtype=jnp.float32):
    """x: [B, S, D] float32. params: dict of weights (PyTorch conventions)."""
    B, S, D = x.shape
    assert D % n_head == 0
    hd = D // n_head
    D4 = 4 * D
    bt = _pick_batch_tile(B, S)
    scale = 1.0 / math.sqrt(hd)

    f32 = jnp.float32
    w_dt = matmul_dtype

    # ---- parameter prep (trace-time glue, not the hot path) ----
    w_in_t = params["in_proj_weight"].T.astype(f32)                 # [D, 3D]
    w_in_t = jnp.concatenate([w_in_t[:, :D] * scale, w_in_t[:, D:]], axis=1).astype(w_dt)
    b_in = params["in_proj_bias"].astype(f32)
    b_in = jnp.concatenate([b_in[:D] * scale, b_in[D:]])[None, :]   # [1, 3D]
    w_out_h = params["out_proj_weight"].T.reshape(n_head, hd, D).astype(w_dt)  # [H, hd, D]
    b_out = params["out_proj_bias"][None, :].astype(f32)            # [1, D]
    w_fc_t = params["c_fc_weight"].T.astype(w_dt)                   # [D, 4D]
    b_fc = params["c_fc_bias"][None, :].astype(f32)                 # [1, 4D]
    w_proj_t = params["c_proj_weight"].T.astype(w_dt)               # [4D, D]
    b_proj = params["c_proj_bias"][None, :].astype(f32)             # [1, D]
    ln1_g = params["ln1_gamma"][None, :].astype(f32)
    ln1_b = params["ln1_beta"][None, :].astype(f32)
    ln2_g = params["ln2_gamma"][None, :].astype(f32)
    ln2_b = params["ln2_beta"][None, :].astype(f32)

    kernel = functools.partial(_block_kernel, d_model=D, n_head=n_head,
                               bt=bt, seq=S, matmul_dtype=w_dt)

    vmem_limit = _vmem_limit_bytes(bt, S, D, jnp.dtype(w_dt).itemsize,
                                   jnp.dtype(x.dtype).itemsize)

    def const_spec(shape):
        # Constant index map => DMA'd once, reused across every batch tile.
        zeros = (0,) * len(shape)
        return pl.BlockSpec(shape, lambda b: zeros)

    call = pl.pallas_call(
        kernel,
        out_shape=jax.ShapeDtypeStruct((B, S, D), x.dtype),
        grid_spec=pltpu.PrefetchScalarGridSpec(
            num_scalar_prefetch=0,
            grid=(B // bt,),
            in_specs=[
                pl.BlockSpec((bt, S, D), lambda b: (b, 0, 0)),   # x
                const_spec((1, D)), const_spec((1, D)),          # ln1 gamma/beta
                const_spec((D, 3 * D)), const_spec((1, 3 * D)),  # in_proj
                const_spec((n_head, hd, D)), const_spec((1, D)), # out_proj (per head)
                const_spec((1, D)), const_spec((1, D)),          # ln2 gamma/beta
                const_spec((D, D4)), const_spec((1, D4)),        # c_fc
                const_spec((D4, D)), const_spec((1, D)),         # c_proj
            ],
            out_specs=pl.BlockSpec((bt, S, D), lambda b: (b, 0, 0)),
        ),
        compiler_params=pltpu.CompilerParams(
            dimension_semantics=("parallel",),
            vmem_limit_bytes=vmem_limit),
    )

    return call(x, ln1_g, ln1_b, w_in_t, b_in, w_out_h, b_out,
                ln2_g, ln2_b, w_fc_t, b_fc, w_proj_t, b_proj)


# ---------------- pure-JAX reference (for correctness check) ----------------
def _ref_forward(x, p, n_head):
    D = x.shape[-1]
    hd = D // n_head

    def ln(x, g, b):
        mu = jnp.mean(x, -1, keepdims=True)
        var = jnp.mean((x - mu) ** 2, -1, keepdims=True)
        return (x - mu) / jnp.sqrt(var + 1e-5) * g + b

    h = ln(x, p["ln1_gamma"], p["ln1_beta"])
    qkv = h @ p["in_proj_weight"].T + p["in_proj_bias"]
    q, k, v = jnp.split(qkv, 3, axis=-1)
    B, S, _ = x.shape
    q = q.reshape(B, S, n_head, hd).transpose(0, 2, 1, 3) / math.sqrt(hd)
    k = k.reshape(B, S, n_head, hd).transpose(0, 2, 1, 3)
    v = v.reshape(B, S, n_head, hd).transpose(0, 2, 1, 3)
    s = jnp.einsum("bhqd,bhkd->bhqk", q, k)
    p_attn = jax.nn.softmax(s, axis=-1)
    o = jnp.einsum("bhqk,bhkd->bhqd", p_attn, v).transpose(0, 2, 1, 3).reshape(B, S, D)
    o = o @ p["out_proj_weight"].T + p["out_proj_bias"]
    x1 = x + o
    h2 = ln(x1, p["ln2_gamma"], p["ln2_beta"])
    fc = h2 @ p["c_fc_weight"].T + p["c_fc_bias"]
    fc = fc * jax.nn.sigmoid(1.702 * fc)
    return x1 + fc @ p["c_proj_weight"].T + p["c_proj_bias"]


if __name__ == "__main__":
    B, S, D, H = 2, 8, 32, 4
    key = jax.random.PRNGKey(0)
    ks = jax.random.split(key, 9)

    params = {
        "ln1_gamma": jnp.ones((D,), jnp.float32),
        "ln1_beta": jnp.zeros((D,), jnp.float32),
        "ln2_gamma": jnp.ones((D,), jnp.float32),
        "ln2_beta": jnp.zeros((D,), jnp.float32),
        "in_proj_weight": 0.05 * jax.random.normal(ks[0], (3 * D, D), jnp.float32),
        "in_proj_bias": 0.01 * jax.random.normal(ks[1], (3 * D,), jnp.float32),
        "out_proj_weight": 0.05 * jax.random.normal(ks[2], (D, D), jnp.float32),
        "out_proj_bias": 0.01 * jax.random.normal(ks[3], (D,), jnp.float32),
        "c_fc_weight": 0.05 * jax.random.normal(ks[4], (4 * D, D), jnp.float32),
        "c_fc_bias": 0.01 * jax.random.normal(ks[5], (4 * D,), jnp.float32),
        "c_proj_weight": 0.05 * jax.random.normal(ks[6], (D, 4 * D), jnp.float32),
        "c_proj_bias": 0.01 * jax.random.normal(ks[7], (D,), jnp.float32),
    }

    x = jax.random.normal(ks[8], (B, S, D), jnp.float32)

    out = residual_attention_block(x, params, n_head=H)
    out = jax.block_until_ready(out)

    ref = _ref_forward(x, params, H)
    assert out.shape == (B, S, D)
    # tolerance re-baselined for the approximate softmax reciprocal (fp32 matmuls by default)
    assert jnp.allclose(out, ref, atol=5e-3, rtol=5e-3), "mismatch vs JAX reference"

    print("KERNEL_OK")
</pallas_src>

<mosaic_0001>
module attributes {stable_mosaic.version = 11 : i64} {
  func.func @_block_kernel(%arg0: i32, %arg1: memref<2x8x32xf32, #tpu.memory_space<vmem>>, %arg2: memref<1x32xf32, #tpu.memory_space<vmem>>, %arg3: memref<1x32xf32, #tpu.memory_space<vmem>>, %arg4: memref<32x96xf32, #tpu.memory_space<vmem>>, %arg5: memref<1x96xf32, #tpu.memory_space<vmem>>, %arg6: memref<4x8x32xf32, #tpu.memory_space<vmem>>, %arg7: memref<1x32xf32, #tpu.memory_space<vmem>>, %arg8: memref<1x32xf32, #tpu.memory_space<vmem>>, %arg9: memref<1x32xf32, #tpu.memory_space<vmem>>, %arg10: memref<32x128xf32, #tpu.memory_space<vmem>>, %arg11: memref<1x128xf32, #tpu.memory_space<vmem>>, %arg12: memref<128x32xf32, #tpu.memory_space<vmem>>, %arg13: memref<1x32xf32, #tpu.memory_space<vmem>>, %arg14: memref<2x8x32xf32, #tpu.memory_space<vmem>>) attributes {dimension_semantics = [#tpu.dimension_semantics<parallel>], iteration_bounds = array<i64: 1>, scalar_prefetch = 0 : i64, scratch_operands = 0 : i64, tpu.core_type = #tpu.core_type<tc>, window_params = [{transform_indices = @transform_0, window_bounds = array<i64: 2, 8, 32>}, {pipeline_mode = #tpu.pipeline_mode<synchronous>, transform_indices = @transform_1, window_bounds = array<i64: 1, 32>}, {pipeline_mode = #tpu.pipeline_mode<synchronous>, transform_indices = @transform_2, window_bounds = array<i64: 1, 32>}, {pipeline_mode = #tpu.pipeline_mode<synchronous>, transform_indices = @transform_3, window_bounds = array<i64: 32, 96>}, {pipeline_mode = #tpu.pipeline_mode<synchronous>, transform_indices = @transform_4, window_bounds = array<i64: 1, 96>}, {pipeline_mode = #tpu.pipeline_mode<synchronous>, transform_indices = @transform_5, window_bounds = array<i64: 4, 8, 32>}, {pipeline_mode = #tpu.pipeline_mode<synchronous>, transform_indices = @transform_6, window_bounds = array<i64: 1, 32>}, {pipeline_mode = #tpu.pipeline_mode<synchronous>, transform_indices = @transform_7, window_bounds = array<i64: 1, 32>}, {pipeline_mode = #tpu.pipeline_mode<synchronous>, transform_indices = @transform_8, window_bounds = array<i64: 1, 32>}, {pipeline_mode = #tpu.pipeline_mode<synchronous>, transform_indices = @transform_9, window_bounds = array<i64: 32, 128>}, {pipeline_mode = #tpu.pipeline_mode<synchronous>, transform_indices = @transform_10, window_bounds = array<i64: 1, 128>}, {pipeline_mode = #tpu.pipeline_mode<synchronous>, transform_indices = @transform_11, window_bounds = array<i64: 128, 32>}, {pipeline_mode = #tpu.pipeline_mode<synchronous>, transform_indices = @transform_12, window_bounds = array<i64: 1, 32>}, {transform_indices = @transform_13, window_bounds = array<i64: 2, 8, 32>}]} {
    %c0 = arith.constant 0 : index
    %c0_0 = arith.constant 0 : index
    %c0_1 = arith.constant 0 : index
    %0 = vector.load %arg1[%c0, %c0_0, %c0_1] : memref<2x8x32xf32, #tpu.memory_space<vmem>>, vector<2x8x32xf32>
    %1 = vector.shape_cast %0 : vector<2x8x32xf32> to vector<16x32xf32>
    %c0_2 = arith.constant 0 : index
    %c0_3 = arith.constant 0 : index
    %2 = vector.load %arg2[%c0_2, %c0_3] : memref<1x32xf32, #tpu.memory_space<vmem>>, vector<1x32xf32>
    %c0_4 = arith.constant 0 : index
    %c0_5 = arith.constant 0 : index
    %3 = vector.load %arg3[%c0_4, %c0_5] : memref<1x32xf32, #tpu.memory_space<vmem>>, vector<1x32xf32>
    %cst = arith.constant dense<0.000000e+00> : vector<16xf32>
    %4 = vector.multi_reduction <add>, %1, %cst [1] : vector<16x32xf32> to vector<16xf32>
    %5 = vector.shape_cast %4 : vector<16xf32> to vector<16x1xf32>
    %cst_6 = arith.constant 3.200000e+01 : f32
    %6 = vector.broadcast %cst_6 : f32 to vector<16x1xf32>
    %7 = arith.divf %5, %6 : vector<16x1xf32>
    %8 = vector.broadcast %7 : vector<16x1xf32> to vector<16x32xf32>
    %9 = arith.subf %1, %8 : vector<16x32xf32>
    %10 = arith.mulf %9, %9 : vector<16x32xf32>
    %cst_7 = arith.constant dense<0.000000e+00> : vector<16xf32>
    %11 = vector.multi_reduction <add>, %10, %cst_7 [1] : vector<16x32xf32> to vector<16xf32>
    %12 = vector.shape_cast %11 : vector<16xf32> to vector<16x1xf32>
    %cst_8 = arith.constant 3.200000e+01 : f32
    %13 = vector.broadcast %cst_8 : f32 to vector<16x1xf32>
    %14 = arith.divf %12, %13 : vector<16x1xf32>
    %cst_9 = arith.constant 9.99999974E-6 : f32
    %15 = vector.broadcast %cst_9 : f32 to vector<16x1xf32>
    %16 = arith.addf %14, %15 : vector<16x1xf32>
    %17 = math.rsqrt %16 : vector<16x1xf32>
    %18 = vector.broadcast %17 : vector<16x1xf32> to vector<16x32xf32>
    %19 = arith.mulf %9, %18 : vector<16x32xf32>
    %20 = vector.broadcast %2 : vector<1x32xf32> to vector<16x32xf32>
    %21 = arith.mulf %19, %20 : vector<16x32xf32>
    %22 = vector.broadcast %3 : vector<1x32xf32> to vector<16x32xf32>
    %23 = arith.addf %21, %22 : vector<16x32xf32>
    %c0_10 = arith.constant 0 : index
    %c0_11 = arith.constant 0 : index
    %24 = vector.load %arg4[%c0_10, %c0_11] : memref<32x96xf32, #tpu.memory_space<vmem>>, vector<32x96xf32>
    %cst_12 = arith.constant dense<0.000000e+00> : vector<16x96xf32>
    %25 = tpu.matmul %23, %24, %cst_12 {dimension_numbers = #tpu.dot_dimension_numbers<[1], [0], [0], [1], [0, 0, 1, 1], [], []>} : vector<16x32xf32>, vector<32x96xf32>, vector<16x96xf32> -> vector<16x96xf32>
    %c0_13 = arith.constant 0 : index
    %c0_14 = arith.constant 0 : index
    %26 = vector.load %arg5[%c0_13, %c0_14] : memref<1x96xf32, #tpu.memory_space<vmem>>, vector<1x96xf32>
    %27 = vector.broadcast %26 : vector<1x96xf32> to vector<16x96xf32>
    %28 = arith.addf %25, %27 : vector<16x96xf32>
    %cst_15 = arith.constant 0.000000e+00 : f32
    %29 = vector.broadcast %cst_15 : f32 to vector<16x32xf32>
    %30 = vector.extract_strided_slice %28 {offsets = [0, 0], sizes = [16, 8], strides = [1, 1]} : vector<16x96xf32> to vector<16x8xf32>
    %31 = vector.extract_strided_slice %28 {offsets = [0, 32], sizes = [16, 8], strides = [1, 1]} : vector<16x96xf32> to vector<16x8xf32>
    %32 = vector.extract_strided_slice %28 {offsets = [0, 64], sizes = [16, 8], strides = [1, 1]} : vector<16x96xf32> to vector<16x8xf32>
    %33 = vector.shape_cast %30 : vector<16x8xf32> to vector<2x8x8xf32>
    %34 = vector.shape_cast %31 : vector<16x8xf32> to vector<2x8x8xf32>
    %35 = vector.shape_cast %32 : vector<16x8xf32> to vector<2x8x8xf32>
    "tpu.trace_start"() <{level = 10 : i32, message = "bqe,bke->bqk"}> : () -> ()
    %cst_16 = arith.constant dense<0.000000e+00> : vector<2x8x8xf32>
    %36 = tpu.matmul %33, %34, %cst_16 {dimension_numbers = #tpu.dot_dimension_numbers<[2], [2], [1], [1], [0, 0, 0, 1, 1, 1], [0], [0]>} : vector<2x8x8xf32>, vector<2x8x8xf32>, vector<2x8x8xf32> -> vector<2x8x8xf32>
    "tpu.trace_stop"() : () -> ()
    %cst_17 = arith.constant dense<0xFF800000> : vector<2x8xf32>
    %37 = vector.multi_reduction <maximumf>, %36, %cst_17 [2] : vector<2x8x8xf32> to vector<2x8xf32>
    %38 = vector.shape_cast %37 : vector<2x8xf32> to vector<2x8x1xf32>
    %39 = vector.broadcast %38 : vector<2x8x1xf32> to vector<2x8x8xf32>
    %40 = arith.subf %36, %39 : vector<2x8x8xf32>
    %41 = math.exp %40 : vector<2x8x8xf32>
    %cst_18 = arith.constant dense<0.000000e+00> : vector<2x8xf32>
    %42 = vector.multi_reduction <add>, %41, %cst_18 [2] : vector<2x8x8xf32> to vector<2x8xf32>
    %43 = vector.shape_cast %42 : vector<2x8xf32> to vector<2x8x1xf32>
    %44 = tpu.reciprocal %43 {approx = true} : vector<2x8x1xf32> -> vector<2x8x1xf32>
    %45 = vector.broadcast %44 : vector<2x8x1xf32> to vector<2x8x8xf32>
    %46 = arith.mulf %41, %45 : vector<2x8x8xf32>
    "tpu.trace_start"() <{level = 10 : i32, message = "bqk,bke->bqe"}> : () -> ()
    %cst_19 = arith.constant dense<0.000000e+00> : vector<2x8x8xf32>
    %47 = tpu.matmul %46, %35, %cst_19 {dimension_numbers = #tpu.dot_dimension_numbers<[2], [1], [1], [2], [0, 0, 0, 1, 1, 2], [0], [0]>} : vector<2x8x8xf32>, vector<2x8x8xf32>, vector<2x8x8xf32> -> vector<2x8x8xf32>
    "tpu.trace_stop"() : () -> ()
    %48 = vector.shape_cast %47 : vector<2x8x8xf32> to vector<16x8xf32>
    %c0_20 = arith.constant 0 : index
    %c0_21 = arith.constant 0 : index
    %c0_22 = arith.constant 0 : index
    %49 = vector.load %arg6[%c0_20, %c0_21, %c0_22] : memref<4x8x32xf32, #tpu.memory_space<vmem>>, vector<1x8x32xf32>
    %50 = vector.shape_cast %49 : vector<1x8x32xf32> to vector<8x32xf32>
    %cst_23 = arith.constant dense<0.000000e+00> : vector<16x32xf32>
    %51 = tpu.matmul %48, %50, %cst_23 {dimension_numbers = #tpu.dot_dimension_numbers<[1], [0], [0], [1], [0, 0, 1, 1], [], []>} : vector<16x8xf32>, vector<8x32xf32>, vector<16x32xf32> -> vector<16x32xf32>
    %52 = arith.addf %29, %51 : vector<16x32xf32>
    %53 = vector.extract_strided_slice %28 {offsets = [0, 8], sizes = [16, 8], strides = [1, 1]} : vector<16x96xf32> to vector<16x8xf32>
    %54 = vector.extract_strided_slice %28 {offsets = [0, 40], sizes = [16, 8], strides = [1, 1]} : vector<16x96xf32> to vector<16x8xf32>
    %55 = vector.extract_strided_slice %28 {offsets = [0, 72], sizes = [16, 8], strides = [1, 1]} : vector<16x96xf32> to vector<16x8xf32>
    %56 = vector.shape_cast %53 : vector<16x8xf32> to vector<2x8x8xf32>
    %57 = vector.shape_cast %54 : vector<16x8xf32> to vector<2x8x8xf32>
    %58 = vector.shape_cast %55 : vector<16x8xf32> to vector<2x8x8xf32>
    "tpu.trace_start"() <{level = 10 : i32, message = "bqe,bke->bqk"}> : () -> ()
    %cst_24 = arith.constant dense<0.000000e+00> : vector<2x8x8xf32>
    %59 = tpu.matmul %56, %57, %cst_24 {dimension_numbers = #tpu.dot_dimension_numbers<[2], [2], [1], [1], [0, 0, 0, 1, 1, 1], [0], [0]>} : vector<2x8x8xf32>, vector<2x8x8xf32>, vector<2x8x8xf32> -> vector<2x8x8xf32>
    "tpu.trace_stop"() : () -> ()
    %cst_25 = arith.constant dense<0xFF800000> : vector<2x8xf32>
    %60 = vector.multi_reduction <maximumf>, %59, %cst_25 [2] : vector<2x8x8xf32> to vector<2x8xf32>
    %61 = vector.shape_cast %60 : vector<2x8xf32> to vector<2x8x1xf32>
    %62 = vector.broadcast %61 : vector<2x8x1xf32> to vector<2x8x8xf32>
    %63 = arith.subf %59, %62 : vector<2x8x8xf32>
    %64 = math.exp %63 : vector<2x8x8xf32>
    %cst_26 = arith.constant dense<0.000000e+00> : vector<2x8xf32>
    %65 = vector.multi_reduction <add>, %64, %cst_26 [2] : vector<2x8x8xf32> to vector<2x8xf32>
    %66 = vector.shape_cast %65 : vector<2x8xf32> to vector<2x8x1xf32>
    %67 = tpu.reciprocal %66 {approx = true} : vector<2x8x1xf32> -> vector<2x8x1xf32>
    %68 = vector.broadcast %67 : vector<2x8x1xf32> to vector<2x8x8xf32>
    %69 = arith.mulf %64, %68 : vector<2x8x8xf32>
    "tpu.trace_start"() <{level = 10 : i32, message = "bqk,bke->bqe"}> : () -> ()
    %cst_27 = arith.constant dense<0.000000e+00> : vector<2x8x8xf32>
    %70 = tpu.matmul %69, %58, %cst_27 {dimension_numbers = #tpu.dot_dimension_numbers<[2], [1], [1], [2], [0, 0, 0, 1, 1, 2], [0], [0]>} : vector<2x8x8xf32>, vector<2x8x8xf32>, vector<2x8x8xf32> -> vector<2x8x8xf32>
    "tpu.trace_stop"() : () -> ()
    %71 = vector.shape_cast %70 : vector<2x8x8xf32> to vector<16x8xf32>
    %c1 = arith.constant 1 : index
    %c0_28 = arith.constant 0 : index
    %c0_29 = arith.constant 0 : index
    %72 = vector.load %arg6[%c1, %c0_28, %c0_29] : memref<4x8x32xf32, #tpu.memory_space<vmem>>, vector<1x8x32xf32>
    %73 = vector.shape_cast %72 : vector<1x8x32xf32> to vector<8x32xf32>
    %cst_30 = arith.constant dense<0.000000e+00> : vector<16x32xf32>
    %74 = tpu.matmul %71, %73, %cst_30 {dimension_numbers = #tpu.dot_dimension_numbers<[1], [0], [0], [1], [0, 0, 1, 1], [], []>} : vector<16x8xf32>, vector<8x32xf32>, vector<16x32xf32> -> vector<16x32xf32>
    %75 = arith.addf %52, %74 : vector<16x32xf32>
    %76 = vector.extract_strided_slice %28 {offsets = [0, 16], sizes = [16, 8], strides = [1, 1]} : vector<16x96xf32> to vector<16x8xf32>
    %77 = vector.extract_strided_slice %28 {offsets = [0, 48], sizes = [16, 8], strides = [1, 1]} : vector<16x96xf32> to vector<16x8xf32>
    %78 = vector.extract_strided_slice %28 {offsets = [0, 80], sizes = [16, 8], strides = [1, 1]} : vector<16x96xf32> to vector<16x8xf32>
    %79 = vector.shape_cast %76 : vector<16x8xf32> to vector<2x8x8xf32>
    %80 = vector.shape_cast %77 : vector<16x8xf32> to vector<2x8x8xf32>
    %81 = vector.shape_cast %78 : vector<16x8xf32> to vector<2x8x8xf32>
    "tpu.trace_start"() <{level = 10 : i32, message = "bqe,bke->bqk"}> : () -> ()
    %cst_31 = arith.constant dense<0.000000e+00> : vector<2x8x8xf32>
    %82 = tpu.matmul %79, %80, %cst_31 {dimension_numbers = #tpu.dot_dimension_numbers<[2], [2], [1], [1], [0, 0, 0, 1, 1, 1], [0], [0]>} : vector<2x8x8xf32>, vector<2x8x8xf32>, vector<2x8x8xf32> -> vector<2x8x8xf32>
    "tpu.trace_stop"() : () -> ()
    %cst_32 = arith.constant dense<0xFF800000> : vector<2x8xf32>
    %83 = vector.multi_reduction <maximumf>, %82, %cst_32 [2] : vector<2x8x8xf32> to vector<2x8xf32>
    %84 = vector.shape_cast %83 : vector<2x8xf32> to vector<2x8x1xf32>
    %85 = vector.broadcast %84 : vector<2x8x1xf32> to vector<2x8x8xf32>
    %86 = arith.subf %82, %85 : vector<2x8x8xf32>
    %87 = math.exp %86 : vector<2x8x8xf32>
    %cst_33 = arith.constant dense<0.000000e+00> : vector<2x8xf32>
    %88 = vector.multi_reduction <add>, %87, %cst_33 [2] : vector<2x8x8xf32> to vector<2x8xf32>
    %89 = vector.shape_cast %88 : vector<2x8xf32> to vector<2x8x1xf32>
    %90 = tpu.reciprocal %89 {approx = true} : vector<2x8x1xf32> -> vector<2x8x1xf32>
    %91 = vector.broadcast %90 : vector<2x8x1xf32> to vector<2x8x8xf32>
    %92 = arith.mulf %87, %91 : vector<2x8x8xf32>
    "tpu.trace_start"() <{level = 10 : i32, message = "bqk,bke->bqe"}> : () -> ()
    %cst_34 = arith.constant dense<0.000000e+00> : vector<2x8x8xf32>
    %93 = tpu.matmul %92, %81, %cst_34 {dimension_numbers = #tpu.dot_dimension_numbers<[2], [1], [1], [2], [0, 0, 0, 1, 1, 2], [0], [0]>} : vector<2x8x8xf32>, vector<2x8x8xf32>, vector<2x8x8xf32> -> vector<2x8x8xf32>
    "tpu.trace_stop"() : () -> ()
    %94 = vector.shape_cast %93 : vector<2x8x8xf32> to vector<16x8xf32>
    %c2 = arith.constant 2 : index
    %c0_35 = arith.constant 0 : index
    %c0_36 = arith.constant 0 : index
    %95 = vector.load %arg6[%c2, %c0_35, %c0_36] : memref<4x8x32xf32, #tpu.memory_space<vmem>>, vector<1x8x32xf32>
    %96 = vector.shape_cast %95 : vector<1x8x32xf32> to vector<8x32xf32>
    %cst_37 = arith.constant dense<0.000000e+00> : vector<16x32xf32>
    %97 = tpu.matmul %94, %96, %cst_37 {dimension_numbers = #tpu.dot_dimension_numbers<[1], [0], [0], [1], [0, 0, 1, 1], [], []>} : vector<16x8xf32>, vector<8x32xf32>, vector<16x32xf32> -> vector<16x32xf32>
    %98 = arith.addf %75, %97 : vector<16x32xf32>
    %99 = vector.extract_strided_slice %28 {offsets = [0, 24], sizes = [16, 8], strides = [1, 1]} : vector<16x96xf32> to vector<16x8xf32>
    %100 = vector.extract_strided_slice %28 {offsets = [0, 56], sizes = [16, 8], strides = [1, 1]} : vector<16x96xf32> to vector<16x8xf32>
    %101 = vector.extract_strided_slice %28 {offsets = [0, 88], sizes = [16, 8], strides = [1, 1]} : vector<16x96xf32> to vector<16x8xf32>
    %102 = vector.shape_cast %99 : vector<16x8xf32> to vector<2x8x8xf32>
    %103 = vector.shape_cast %100 : vector<16x8xf32> to vector<2x8x8xf32>
    %104 = vector.shape_cast %101 : vector<16x8xf32> to vector<2x8x8xf32>
    "tpu.trace_start"() <{level = 10 : i32, message = "bqe,bke->bqk"}> : () -> ()
    %cst_38 = arith.constant dense<0.000000e+00> : vector<2x8x8xf32>
    %105 = tpu.matmul %102, %103, %cst_38 {dimension_numbers = #tpu.dot_dimension_numbers<[2], [2], [1], [1], [0, 0, 0, 1, 1, 1], [0], [0]>} : vector<2x8x8xf32>, vector<2x8x8xf32>, vector<2x8x8xf32> -> vector<2x8x8xf32>
    "tpu.trace_stop"() : () -> ()
    %cst_39 = arith.constant dense<0xFF800000> : vector<2x8xf32>
    %106 = vector.multi_reduction <maximumf>, %105, %cst_39 [2] : vector<2x8x8xf32> to vector<2x8xf32>
    %107 = vector.shape_cast %106 : vector<2x8xf32> to vector<2x8x1xf32>
    %108 = vector.broadcast %107 : vector<2x8x1xf32> to vector<2x8x8xf32>
    %109 = arith.subf %105, %108 : vector<2x8x8xf32>
    %110 = math.exp %109 : vector<2x8x8xf32>
    %cst_40 = arith.constant dense<0.000000e+00> : vector<2x8xf32>
    %111 = vector.multi_reduction <add>, %110, %cst_40 [2] : vector<2x8x8xf32> to vector<2x8xf32>
    %112 = vector.shape_cast %111 : vector<2x8xf32> to vector<2x8x1xf32>
    %113 = tpu.reciprocal %112 {approx = true} : vector<2x8x1xf32> -> vector<2x8x1xf32>
    %114 = vector.broadcast %113 : vector<2x8x1xf32> to vector<2x8x8xf32>
    %115 = arith.mulf %110, %114 : vector<2x8x8xf32>
    "tpu.trace_start"() <{level = 10 : i32, message = "bqk,bke->bqe"}> : () -> ()
    %cst_41 = arith.constant dense<0.000000e+00> : vector<2x8x8xf32>
    %116 = tpu.matmul %115, %104, %cst_41 {dimension_numbers = #tpu.dot_dimension_numbers<[2], [1], [1], [2], [0, 0, 0, 1, 1, 2], [0], [0]>} : vector<2x8x8xf32>, vector<2x8x8xf32>, vector<2x8x8xf32> -> vector<2x8x8xf32>
    "tpu.trace_stop"() : () -> ()
    %117 = vector.shape_cast %116 : vector<2x8x8xf32> to vector<16x8xf32>
    %c3 = arith.constant 3 : index
    %c0_42 = arith.constant 0 : index
    %c0_43 = arith.constant 0 : index
    %118 = vector.load %arg6[%c3, %c0_42, %c0_43] : memref<4x8x32xf32, #tpu.memory_space<vmem>>, vector<1x8x32xf32>
    %119 = vector.shape_cast %118 : vector<1x8x32xf32> to vector<8x32xf32>
    %cst_44 = arith.constant dense<0.000000e+00> : vector<16x32xf32>
    %120 = tpu.matmul %117, %119, %cst_44 {dimension_numbers = #tpu.dot_dimension_numbers<[1], [0], [0], [1], [0, 0, 1, 1], [], []>} : vector<16x8xf32>, vector<8x32xf32>, vector<16x32xf32> -> vector<16x32xf32>
    %121 = arith.addf %98, %120 : vector<16x32xf32>
    %122 = arith.addf %1, %121 : vector<16x32xf32>
    %c0_45 = arith.constant 0 : index
    %c0_46 = arith.constant 0 : index
    %123 = vector.load %arg7[%c0_45, %c0_46] : memref<1x32xf32, #tpu.memory_space<vmem>>, vector<1x32xf32>
    %124 = vector.broadcast %123 : vector<1x32xf32> to vector<16x32xf32>
    %125 = arith.addf %122, %124 : vector<16x32xf32>
    %c0_47 = arith.constant 0 : index
    %c0_48 = arith.constant 0 : index
    %126 = vector.load %arg8[%c0_47, %c0_48] : memref<1x32xf32, #tpu.memory_space<vmem>>, vector<1x32xf32>
    %c0_49 = arith.constant 0 : index
    %c0_50 = arith.constant 0 : index
    %127 = vector.load %arg9[%c0_49, %c0_50] : memref<1x32xf32, #tpu.memory_space<vmem>>, vector<1x32xf32>
    %cst_51 = arith.constant dense<0.000000e+00> : vector<16xf32>
    %128 = vector.multi_reduction <add>, %125, %cst_51 [1] : vector<16x32xf32> to vector<16xf32>
    %129 = vector.shape_cast %128 : vector<16xf32> to vector<16x1xf32>
    %cst_52 = arith.constant 3.200000e+01 : f32
    %130 = vector.broadcast %cst_52 : f32 to vector<16x1xf32>
    %131 = arith.divf %129, %130 : vector<16x1xf32>
    %132 = vector.broadcast %131 : vector<16x1xf32> to vector<16x32xf32>
    %133 = arith.subf %125, %132 : vector<16x32xf32>
    %134 = arith.mulf %133, %133 : vector<16x32xf32>
    %cst_53 = arith.constant dense<0.000000e+00> : vector<16xf32>
    %135 = vector.multi_reduction <add>, %134, %cst_53 [1] : vector<16x32xf32> to vector<16xf32>
    %136 = vector.shape_cast %135 : vector<16xf32> to vector<16x1xf32>
    %cst_54 = arith.constant 3.200000e+01 : f32
    %137 = vector.broadcast %cst_54 : f32 to vector<16x1xf32>
    %138 = arith.divf %136, %137 : vector<16x1xf32>
    %cst_55 = arith.constant 9.99999974E-6 : f32
    %139 = vector.broadcast %cst_55 : f32 to vector<16x1xf32>
    %140 = arith.addf %138, %139 : vector<16x1xf32>
    %141 = math.rsqrt %140 : vector<16x1xf32>
    %142 = vector.broadcast %141 : vector<16x1xf32> to vector<16x32xf32>
    %143 = arith.mulf %133, %142 : vector<16x32xf32>
    %144 = vector.broadcast %126 : vector<1x32xf32> to vector<16x32xf32>
    %145 = arith.mulf %143, %144 : vector<16x32xf32>
    %146 = vector.broadcast %127 : vector<1x32xf32> to vector<16x32xf32>
    %147 = arith.addf %145, %146 : vector<16x32xf32>
    %c0_56 = arith.constant 0 : index
    %c0_57 = arith.constant 0 : index
    %148 = vector.load %arg10[%c0_56, %c0_57] : memref<32x128xf32, #tpu.memory_space<vmem>>, vector<32x128xf32>
    %cst_58 = arith.constant dense<0.000000e+00> : vector<16x128xf32>
    %149 = tpu.matmul %147, %148, %cst_58 {dimension_numbers = #tpu.dot_dimension_numbers<[1], [0], [0], [1], [0, 0, 1, 1], [], []>} : vector<16x32xf32>, vector<32x128xf32>, vector<16x128xf32> -> vector<16x128xf32>
    %c0_59 = arith.constant 0 : index
    %c0_60 = arith.constant 0 : index
    %150 = vector.load %arg11[%c0_59, %c0_60] : memref<1x128xf32, #tpu.memory_space<vmem>>, vector<1x128xf32>
    %151 = vector.broadcast %150 : vector<1x128xf32> to vector<16x128xf32>
    %152 = arith.addf %149, %151 : vector<16x128xf32>
    %cst_61 = arith.constant 1.702000e+00 : f32
    %153 = vector.broadcast %cst_61 : f32 to vector<16x128xf32>
    %154 = arith.mulf %153, %152 : vector<16x128xf32>
    %155 = arith.negf %154 : vector<16x128xf32>
    %156 = math.exp %155 : vector<16x128xf32>
    %cst_62 = arith.constant 1.000000e+00 : f32
    %157 = vector.broadcast %cst_62 : f32 to vector<16x128xf32>
    %158 = arith.addf %157, %156 : vector<16x128xf32>
    %159 = arith.divf %157, %158 : vector<16x128xf32>
    %160 = arith.mulf %152, %159 : vector<16x128xf32>
    %c0_63 = arith.constant 0 : index
    %c0_64 = arith.constant 0 : index
    %161 = vector.load %arg12[%c0_63, %c0_64] : memref<128x32xf32, #tpu.memory_space<vmem>>, vector<128x32xf32>
    %cst_65 = arith.constant dense<0.000000e+00> : vector<16x32xf32>
    %162 = tpu.matmul %160, %161, %cst_65 {dimension_numbers = #tpu.dot_dimension_numbers<[1], [0], [0], [1], [0, 0, 1, 1], [], []>} : vector<16x128xf32>, vector<128x32xf32>, vector<16x32xf32> -> vector<16x32xf32>
    %c0_66 = arith.constant 0 : index
    %c0_67 = arith.constant 0 : index
    %163 = vector.load %arg13[%c0_66, %c0_67] : memref<1x32xf32, #tpu.memory_space<vmem>>, vector<1x32xf32>
    %164 = vector.broadcast %163 : vector<1x32xf32> to vector<16x32xf32>
    %165 = arith.addf %162, %164 : vector<16x32xf32>
    %166 = arith.addf %125, %165 : vector<16x32xf32>
    %167 = vector.shape_cast %166 : vector<16x32xf32> to vector<2x8x32xf32>
    %c0_68 = arith.constant 0 : index
    %c0_69 = arith.constant 0 : index
    %c0_70 = arith.constant 0 : index
    %168 = vector.load %arg14[%c0_68, %c0_69, %c0_70] : memref<2x8x32xf32, #tpu.memory_space<vmem>>, vector<2x8x32xf32>
    tpu.vector_store %arg14[%c0_68, %c0_69, %c0_70], %167 {strides = array<i32>} : memref<2x8x32xf32, #tpu.memory_space<vmem>>, vector<2x8x32xf32>,
    return
  }
  func.func @transform_0(%arg0: i32) -> (i32, i32, i32) {
    %c0_i32 = arith.constant 0 : i32
    %c0_i32_0 = arith.constant 0 : i32
    %c0_i32_1 = arith.constant 0 : i32
    return %arg0, %c0_i32, %c0_i32_0 : i32, i32, i32
  }
  func.func @transform_1(%arg0: i32) -> (i32, i32) {
    %c0_i32 = arith.constant 0 : i32
    %c0_i32_0 = arith.constant 0 : i32
    %c0_i32_1 = arith.constant 0 : i32
    return %c0_i32, %c0_i32_0 : i32, i32
  }
  func.func @transform_2(%arg0: i32) -> (i32, i32) {
    %c0_i32 = arith.constant 0 : i32
    %c0_i32_0 = arith.constant 0 : i32
    %c0_i32_1 = arith.constant 0 : i32
    return %c0_i32, %c0_i32_0 : i32, i32
  }
  func.func @transform_3(%arg0: i32) -> (i32, i32) {
    %c0_i32 = arith.constant 0 : i32
    %c0_i32_0 = arith.constant 0 : i32
    %c0_i32_1 = arith.constant 0 : i32
    return %c0_i32, %c0_i32_0 : i32, i32
  }
  func.func @transform_4(%arg0: i32) -> (i32, i32) {
    %c0_i32 = arith.constant 0 : i32
    %c0_i32_0 = arith.constant 0 : i32
    %c0_i32_1 = arith.constant 0 : i32
    return %c0_i32, %c0_i32_0 : i32, i32
  }
  func.func @transform_5(%arg0: i32) -> (i32, i32, i32) {
    %c0_i32 = arith.constant 0 : i32
    %c0_i32_0 = arith.constant 0 : i32
    %c0_i32_1 = arith.constant 0 : i32
    %c0_i32_2 = arith.constant 0 : i32
    return %c0_i32, %c0_i32_0, %c0_i32_1 : i32, i32, i32
  }
  func.func @transform_6(%arg0: i32) -> (i32, i32) {
    %c0_i32 = arith.constant 0 : i32
    %c0_i32_0 = arith.constant 0 : i32
    %c0_i32_1 = arith.constant 0 : i32
    return %c0_i32, %c0_i32_0 : i32, i32
  }
  func.func @transform_7(%arg0: i32) -> (i32, i32) {
    %c0_i32 = arith.constant 0 : i32
    %c0_i32_0 = arith.constant 0 : i32
    %c0_i32_1 = arith.constant 0 : i32
    return %c0_i32, %c0_i32_0 : i32, i32
  }
  func.func @transform_8(%arg0: i32) -> (i32, i32) {
    %c0_i32 = arith.constant 0 : i32
    %c0_i32_0 = arith.constant 0 : i32
    %c0_i32_1 = arith.constant 0 : i32
    return %c0_i32, %c0_i32_0 : i32, i32
  }
  func.func @transform_9(%arg0: i32) -> (i32, i32) {
    %c0_i32 = arith.constant 0 : i32
    %c0_i32_0 = arith.constant 0 : i32
    %c0_i32_1 = arith.constant 0 : i32
    return %c0_i32, %c0_i32_0 : i32, i32
  }
  func.func @transform_10(%arg0: i32) -> (i32, i32) {
    %c0_i32 = arith.constant 0 : i32
    %c0_i32_0 = arith.constant 0 : i32
    %c0_i32_1 = arith.constant 0 : i32
    return %c0_i32, %c0_i32_0 : i32, i32
  }
  func.func @transform_11(%arg0: i32) -> (i32, i32) {
    %c0_i32 = arith.constant 0 : i32
    %c0_i32_0 = arith.constant 0 : i32
    %c0_i32_1 = arith.constant 0 : i32
    return %c0_i32, %c0_i32_0 : i32, i32
  }
  func.func @transform_12(%arg0: i32) -> (i32, i32) {
    %c0_i32 = arith.constant 0 : i32
    %c0_i32_0 = arith.constant 0 : i32
    %c0_i32_1 = arith.constant 0 : i32
    return %c0_i32, %c0_i32_0 : i32, i32
  }
  func.func @transform_13(%arg0: i32) -> (i32, i32, i32) {
    %c0_i32 = arith.constant 0 : i32
    %c0_i32_0 = arith.constant 0 : i32
    %c0_i32_1 = arith.constant 0 : i32
    return %arg0, %c0_i32, %c0_i32_0 : i32, i32, i32
  }
}

</mosaic_0001>

<bundles_post_ra>
// kernel: tpu_custom_call.1
= control target key start
LH: loop header
LB: loop body
LE: loop exit
PB: predicated region body
PF: predicated region fallthrough
CT: control target
= control target key end

     0   :  { %vm49_vm0 = vcmask 261120   ;;  %s2926_s0 = inlined_call_operand.vmem [shape: f32[2,8,32], index: 0, kind: input, shape index: {}]   ;;  %s2927_s1 = inlined_call_operand.vmem [shape: f32[1,32], index: 1, kind: input, shape index: {}]   ;;  %s2928_s2 = inlined_call_operand.vmem [shape: f32[1,32], index: 2, kind: input, shape index: {}]   ;;  %s2929_s3 = inlined_call_operand.vmem [shape: f32[32,96], index: 3, kind: input, shape index: {}]   ;;  %s2930_s4 = inlined_call_operand.vmem [shape: f32[1,96], index: 4, kind: input, shape index: {}]   ;;  %s2931_s5 = inlined_call_operand.vmem [shape: f32[4,8,32], index: 5, kind: input, shape index: {}]   ;;  %s2932_s6 = inlined_call_operand.vmem [shape: f32[1,32], index: 6, kind: input, shape index: {}]   ;;  %s2933_s7 = inlined_call_operand.vmem [shape: f32[1,32], index: 7, kind: input, shape index: {}]   ;;  %s2934_s8 = inlined_call_operand.vmem [shape: f32[1,32], index: 8, kind: input, shape index: {}]   ;;  %s2935_s9 = inlined_call_operand.vmem [shape: f32[32,128], index: 9, kind: input, shape index: {}]   ;;  %s2936_s10 = inlined_call_operand.vmem [shape: f32[1,128], index: 10, kind: input, shape index: {}]   ;;  %s2937_s11 = inlined_call_operand.vmem [shape: f32[128,32], index: 11, kind: input, shape index: {}]   ;;  %s2938_s12 = inlined_call_operand.vmem [shape: f32[1,32], index: 12, kind: input, shape index: {}]   ;;  %s2939_s13 = inlined_call_operand.hbm [shape: f32[2,8,32], index: 13, kind: output, shape index: {}]  }
   0x1   :  { %v2631_v0 = vld [vmem:[%s2926_s0] sm:$0xff]  ;;  %v2636_v1 = vld [vmem:[%s2926_s0 + $0x8] sm:$0xff] }
   0x2   :  { %18 = vsyncpa [#allocation3], 0  ;;  %v50_v2 = vsel %vm49_vm0, %v2631_v0, 0.0  ;;  %v53_v3 = vsel %vm49_vm0, %v2636_v1, 0.0  ;;  %v93_v14 = vld [vmem:[%s2929_s3] sm:$0xff]  ;;  %v94_v15 = vld [vmem:[%s2929_s3 + $0x8] sm:$0xff] }
   0x3   :  { %51 = vadd.xlane.f32.xlu0 %v50_v2  ;;  %v95_v16 = vld [vmem:[%s2929_s3 + $0x10] sm:$0xff]  ;;  %v2400_v17 = vpack.c.bf16 %v94_v15, %v93_v14  ;;  %v96_v18 = vld [vmem:[%s2929_s3 + $0x18] sm:$0xff]  ;;  %v2120_v27 = vld [vmem:[%s2927_s1] ss:$0 sm:$0xff]  ;;  %v2542_v36 = vmov 0.0   ;;  %vm2543_vm1 = vmmov 0  }
   0x4   :  { %v2404_v19 = vpack.c.bf16 %v96_v18, %v95_v16  ;;  %v2121_v29 = vld [vmem:[%s2928_s2] ss:$0 sm:$0xff]  ;;  %2284 = vmatprep.subr.mxu0 %v2542_v36  ;;  %2286 = vmatprep.mubr.msk.f32.mxu0 %vm2543_vm1, %v2542_v36  ;;  %s2544_s22 = smov 96   ;;  %vm188_vm2 = vcmask 64512   ;;  %s2546_s23 = smov 88  }
   0x5   :  { %2401 = vmatprep.subr.bf16.mxu1 %v2400_v17  ;;  %v2122_v37 = vld [vmem:[%s2930_s4] ss:$0 sm:$0xff]  ;;  %s2545_s4 = smov 64   ;;  %s2547_s24 = smov 120  }
   0x6   :  { %2403 = vmatpush3.bf16.msra.mxu1 %v2400_v17  ;;  %s2548_s25 = smov 80   ;;  %s2549_s26 = smov 56  }
   0x7   :  { %54 = vadd.xlane.f32.xlu0 %v53_v3  ;;  %2405 = vmatprep.subr.bf16.mxu1 %v2404_v19  ;;  %s2550_s27 = smov 112   ;;  %s2551_s28 = smov 48  }
   0x8   :  { %s2552_s0 = smov 72   ;;  %s2553_s29 = smov 104  }
   0x9   :  { %s2554_s19 = smov 40   ;;  %s2555_s16 = smov [#allocation2]  }
   0xa   :  { %2407 = vmatpush3.bf16.msra.mxu1 %v2404_v19  ;;  %s2109_s17 = sshll.u32 %s2555_s16, 4  ;;  %s2110_s17 = int_to_ptr.vmem [resolvable:$true] %s2109_s17 }
   0xb   :  { %2254 = vmatprep.subr.mxu1 %v2542_v36  ;;  %s2518_s18 = scalar_lea.vmem %s2110_s17, 256  ;;  %p2523_p1 = scmp.lt.s32.totalorder %s2110_s17, %s2110_s17 }
   0xc   :  { %p2519_p0 = scmp.ne.s32.totalorder %s2110_s17, %s2518_s18  ;;  %p2524_p2 = scmp.lt.s32.totalorder %s2518_s18, %s2518_s18 }
   0xe   :  { %p2525_p3 = por %p2524_p2, %p2523_p1 }
  0x10   :  { %p2526_p4 = pnand %p2525_p3, %p2519_p0 }
  0x90   :  { %v52_v4 = vpop.xlane.xlu0 %51 }
  0x91   :  { %v57_v5 = vmul.f32 0.03125, %v52_v4 }
  0x93   :  { %v59_v6 = vsub.f32 %v2631_v0, %v57_v5 }
  0x94   :  { %v55_v7 = vpop.xlane.xlu0 %54 }
  0x95   :  { %v58_v8 = vmul.f32 0.03125, %v55_v7  ;;  %v61_v9 = vmul.f32 %v59_v6, %v59_v6 }
  0x97   :  { %v60_v10 = vsub.f32 %v2636_v1, %v58_v8  ;;  %v63_v11 = vsel %vm49_vm0, %v61_v9, 0.0 }
  0x98   :  { %64 = vadd.xlane.f32.xlu1 %v63_v11 }
  0x99   :  { %v62_v12 = vmul.f32 %v60_v10, %v60_v10 }
  0x9b   :  { %v66_v13 = vsel %vm49_vm0, %v62_v12, 0.0 }
  0x9c   :  { %67 = vadd.xlane.f32.xlu1 %v66_v13 }
 0x125   :  { %v65_v20 = vpop.xlane.xlu1 %64 }
 0x126   :  { %v69_v21 = vmul.f32 0.03125, %v65_v20 }
 0x128   :  { %v71_v22 = vadd.f32 1e-05, %v69_v21 }
 0x129   :  { %v68_v23 = vpop.xlane.xlu1 %67 }
 0x12a   :  { %2470 = vrsqrt.f32 %v71_v22  ;;  %v70_v24 = vmul.f32 0.03125, %v68_v23 }
 0x12c   :  { %v72_v25 = vadd.f32 1e-05, %v70_v24 }
 0x12e   :  { %2472 = vrsqrt.f32 %v72_v25 }
 0x134   :  { %v2471_v26 = vpop.eup %2470 }
 0x135   :  { %v75_v28 = vmul.f32 %v2471_v26, %v59_v6 }
 0x137   :  { %v83_v30 = vmul.f32 %v2120_v27, %v75_v28 }
 0x138   :  { %v2473_v31 = vpop.eup %2472 }
 0x139   :  { %v76_v32 = vmul.f32 %v2473_v31, %v60_v10  ;;  %v91_v33 = vadd.f32 %v2121_v29, %v83_v30 }
 0x13b   :  { %v84_v34 = vmul.f32 %v2120_v27, %v76_v32  ;;  %2251 = vmatprep.mubr.msk.f32.mxu1 %vm49_vm0, %v91_v33 }
 0x13d   :  { %v92_v35 = vadd.f32 %v2121_v29, %v84_v34 }
 0x13f   :  { %2252 = vmatmul.mubr.msk.f32.vlgmr.msra.gmra.mrb[0].mxu1 %vm49_vm0, %v92_v35 }
 0x140   :  { %2256 = vmatprep.mubr.msk.f32.mxu1 %vm2543_vm1, %v2542_v36 }
 0x212   :  { %v2253_v38 = vpop.f32.mrb[0].mxu1 }
 0x213   :  { %v2675_v39 = vadd.f32 %v2253_v38, %v2122_v37  ;;  %v176_v40 = vpop.f32.mrb[1].mxu1 }
 0x214   :  { %v2677_v41 = vadd.f32 %v2122_v37, %v176_v40 }
 0x215   :  { %264 = vrot.lane.b32.xlu1 %v2675_v39, %s2544_s22 }
 0x216   :  { %186 = vrot.lane.b32.xlu0 %v2677_v41, %s2544_s22 }
 0x287   :  { %v265_v43 = vpop.permute.xlu1 %264 }
 0x288   :  { %v187_v42 = vpop.permute.xlu0 %186 }
 0x289   :  { %2255 = vmatpush3.xpose.msk.msra.mxu1 %vm188_vm2, %v187_v42 }
 0x28a   :  { %2259 = vmatprep.subr.mxu1 %v2542_v36 }
 0x28c   :  { %2257 = vmatmul.mubr.msk.f32.vlgmr.msra.gmra.mrb[2].mxu1 %vm188_vm2, %v2677_v41 }
 0x28d   :  { %2260 = vmatpush3.xpose.msk.msra.mxu1 %vm188_vm2, %v265_v43  ;;  %2261 = vmatprep.mubr.msk.f32.mxu1 %vm2543_vm1, %v2542_v36 }
 0x28e   :  { %2264 = vmatprep.subr.mxu1 %v2542_v36 }
 0x290   :  { %2262 = vmatmul.mubr.msk.f32.vlgmr.msra.gmra.mrb[4].mxu1 %vm188_vm2, %v2675_v39 }
 0x291   :  { %2266 = vmatprep.mubr.msk.f32.mxu1 %vm2543_vm1, %v2542_v36 }
 0x35f   :  { %v259_v44 = vpop.f32.mrb[2].mxu1 }
 0x360   :  { %v2258_v45 = vpop.f32.mrb[3].mxu1  ;;  %v340_v46 = vsel %vm188_vm2, %v259_v44, -inf }
 0x361   :  { %341 = vmax.xlane.f32.xlu1 %v340_v46 }
 0x363   :  { %v336_v47 = vpop.f32.mrb[4].mxu1 }
 0x364   :  { %v2263_v48 = vpop.f32.mrb[5].mxu1  ;;  %v343_v49 = vsel %vm188_vm2, %v336_v47, -inf }
 0x365   :  { %344 = vmax.xlane.f32.xlu0 %v343_v49 }
 0x372   :  { %438 = vrot.lane.b32.xlu1 %v2675_v39, %s2545_s4 }
 0x376   :  { %517 = vrot.lane.b32.xlu1 %v2677_v41, %s2546_s23 }
 0x37a   :  { %515 = vrot.lane.b32.xlu1 %v2677_v41, %s2547_s24 }
 0x3ee   :  { %v342_v50 = vpop.xlane.xlu1 %341 }
 0x3ef   :  { %v346_v51 = vsub.f32 %v259_v44, %v342_v50 }
 0x3f1   :  { %v348_v52 = vmul.f32 1.442695, %v346_v51 }
 0x3f2   :  { %v345_v53 = vpop.xlane.xlu0 %344  ;;  %v439_v60 = vpop.permute.xlu1 %438 }
 0x3f3   :  { %2474 = vpow2.f32 %v348_v52  ;;  %v347_v54 = vsub.f32 %v336_v47, %v345_v53 }
 0x3f5   :  { %v350_v55 = vmul.f32 1.442695, %v347_v54  ;;  %v2137_v54 = vld [vmem:[%s2931_s5 + $0x8] sm:$0xff] }
 0x3f6   :  { %v518_v61 = vpop.permute.xlu1 %517 }
 0x3f7   :  { %2476 = vpow2.f32 %v350_v55  ;;  %v514_v55 = vld [vmem:[%s2931_s5] sm:$0xff] }
 0x3fa   :  { %v516_v62 = vpop.permute.xlu1 %515 }
 0x3fd   :  { %v2475_v56 = vpop.eup %2474 }
 0x3fe   :  { %v352_v57 = vsel %vm188_vm2, %v2475_v56, 0.0 }
 0x3ff   :  { %353 = vadd.xlane.f32.xlu0 %v352_v57 }
 0x401   :  { %v2477_v58 = vpop.eup %2476 }
 0x402   :  { %v355_v59 = vsel %vm188_vm2, %v2477_v58, 0.0 }
 0x403   :  { %356 = vadd.xlane.f32.xlu1 %v355_v59 }
 0x414   :  { %593 = vrot.lane.b32.xlu1 %v2675_v39, %s2547_s24 }
 0x415   :  { %362 = vrot.lane.b32.xlu0 %v2677_v41, %s2545_s4 }
 0x418   :  { %1011 = vrot.lane.b32.xlu1 %v2677_v41, %s2548_s25 }
 0x419   :  { %595 = vrot.lane.b32.xlu0 %v2675_v39, %s2546_s23 }
 0x48c   :  { %v354_v63 = vpop.xlane.xlu0 %353 }
 0x48d   :  { %2478 = vrcp.f32 %v354_v63 }
 0x490   :  { %v357_v2 = vpop.xlane.xlu1 %356  ;;  %v363_v3 = vpop.permute.xlu0 %362 }
 0x491   :  { %2480 = vrcp.f32 %v357_v2  ;;  %2265 = vmatpush3.msra.mxu1 %v363_v3 }
 0x492   :  { %2269 = vmatprep.subr.mxu1 %v2542_v36 }
 0x494   :  { %v596_v8 = vpop.permute.xlu0 %595  ;;  %v594_v9 = vpop.permute.xlu1 %593 }
 0x497   :  { %v2479_v4 = vpop.eup %2478 }
 0x498   :  { %v360_v5 = vmul.f32 %v2479_v4, %v2475_v56  ;;  %v1012_v26 = vpop.permute.xlu1 %1011 }
 0x49a   :  { %2267 = vmatmul.mubr.msk.f32.vlgmr.msra.gmra.mrb[6].mxu1 %vm188_vm2, %v360_v5 }
 0x49b   :  { %v2481_v6 = vpop.eup %2480  ;;  %2270 = vmatpush3.msra.mxu1 %v439_v60  ;;  %2271 = vmatprep.mubr.msk.f32.mxu1 %vm2543_vm1, %v2542_v36 }
 0x49c   :  { %v361_v7 = vmul.f32 %v2481_v6, %v2477_v58  ;;  %2274 = vmatprep.subr.mxu1 %v2542_v36 }
 0x49e   :  { %2272 = vmatmul.mubr.msk.f32.vlgmr.msra.gmra.mrb[8].mxu1 %vm188_vm2, %v361_v7 }
 0x49f   :  { %2276 = vmatprep.mubr.msk.f32.mxu1 %vm2543_vm1, %v2542_v36 }
 0x4a2   :  { %2275 = vmatpush3.xpose.msk.msra.mxu1 %vm188_vm2, %v518_v61 }
 0x4a3   :  { %2279 = vmatprep.subr.mxu1 %v2542_v36 }
 0x4a5   :  { %2277 = vmatmul.mubr.msk.f32.vlgmr.msra.gmra.mrb[10].mxu1 %vm188_vm2, %v516_v62 }
 0x4a6   :  { %2280 = vmatpush3.xpose.msk.msra.mxu1 %vm188_vm2, %v596_v8  ;;  %2281 = vmatprep.mubr.msk.f32.mxu1 %vm2543_vm1, %v2542_v36  ;;  %v2148_v8 = vld [vmem:[%s2931_s5 + $0x10] sm:$0xff] }
 0x4a7   :  { %2289 = vmatprep.subr.mxu1 %v2542_v36 }
 0x4a9   :  { %2282 = vmatmul.mubr.msk.f32.vlgmr.msra.gmra.mrb[12].mxu1 %vm188_vm2, %v594_v9 }
 0x4aa   :  { %2291 = vmatprep.mubr.msk.f32.mxu1 %vm2543_vm1, %v2542_v36 }
 0x56d   :  { %v2723_v10 = vpop.f32.mrb[6].mxu1 }
 0x56e   :  { %v2268_v11 = vpop.f32.mrb[7].mxu1 }
 0x571   :  { %v2725_v12 = vpop.f32.mrb[8].mxu1 }
 0x572   :  { %v2273_v13 = vpop.f32.mrb[9].mxu1 }
 0x578   :  { %v589_v14 = vpop.f32.mrb[10].mxu1 }
 0x579   :  { %v2278_v15 = vpop.f32.mrb[11].mxu1  ;;  %v671_v25 = vsel %vm188_vm2, %v589_v14, -inf }
 0x57c   :  { %v667_v16 = vpop.f32.mrb[12].mxu1 }
 0x57d   :  { %v2283_v17 = vpop.f32.mrb[13].mxu1  ;;  %v674_v18 = vsel %vm188_vm2, %v667_v16, -inf }
 0x57e   :  { %675 = vmax.xlane.f32.xlu0 %v674_v18 }
 0x594   :  { %769 = vrot.lane.b32.xlu0 %v2675_v39, %s2549_s26 }
 0x598   :  { %1009 = vrot.lane.b32.xlu0 %v2677_v41, %s2550_s27 }
 0x59c   :  { %1087 = vrot.lane.b32.xlu0 %v2675_v39, %s2550_s27 }
 0x60b   :  { %v676_v19 = vpop.xlane.xlu0 %675 }
 0x60c   :  { %v678_v20 = vsub.f32 %v667_v16, %v676_v19 }
 0x60e   :  { %v681_v21 = vmul.f32 1.442695, %v678_v20 }
 0x60f   :  { %v770_v22 = vpop.permute.xlu0 %769 }
 0x610   :  { %2482 = vpow2.f32 %v681_v21  ;;  %2290 = vmatpush3.msra.mxu1 %v770_v22 }
 0x611   :  { %2304 = vmatprep.subr.mxu1 %v2542_v36 }
 0x613   :  { %v1010_v30 = vpop.permute.xlu0 %1009 }
 0x617   :  { %v1088_v32 = vpop.permute.xlu0 %1087 }
 0x61a   :  { %v2483_v23 = vpop.eup %2482 }
 0x61b   :  { %v686_v24 = vsel %vm188_vm2, %v2483_v23, 0.0 }
 0x61c   :  { %687 = vadd.xlane.f32.xlu1 %v686_v24 }
 0x62d   :  { %1089 = vrot.lane.b32.xlu1 %v2675_v39, %s2548_s25 }
 0x651   :  { %672 = vmax.xlane.f32.xlu1 %v671_v25 }
 0x6a9   :  { %v688_v27 = vpop.xlane.xlu1 %687 }
 0x6aa   :  { %2484 = vrcp.f32 %v688_v27 }
 0x6ad   :  { %v1090_v31 = vpop.permute.xlu1 %1089 }
 0x6b4   :  { %v2485_v28 = vpop.eup %2484 }
 0x6b5   :  { %v692_v29 = vmul.f32 %v2485_v28, %v2483_v23 }
 0x6b7   :  { %2292 = vmatmul.mubr.msk.f32.vlgmr.msra.gmra.mrb[14].mxu1 %vm188_vm2, %v692_v29 }
 0x6b8   :  { %2305 = vmatpush3.xpose.msk.msra.mxu1 %vm188_vm2, %v1012_v26  ;;  %2306 = vmatprep.mubr.msk.f32.mxu1 %vm2543_vm1, %v2542_v36 }
 0x6b9   :  { %2309 = vmatprep.subr.mxu1 %v2542_v36 }
 0x6bb   :  { %2307 = vmatmul.mubr.msk.f32.vlgmr.msra.gmra.mrb[16].mxu1 %vm188_vm2, %v1010_v30 }
 0x6bc   :  { %2310 = vmatpush3.xpose.msk.msra.mxu1 %vm188_vm2, %v1090_v31  ;;  %2311 = vmatprep.mubr.msk.f32.mxu1 %vm2543_vm1, %v2542_v36 }
 0x6bd   :  { %2319 = vmatprep.subr.mxu1 %v2542_v36 }
 0x6bf   :  { %2312 = vmatmul.mubr.msk.f32.vlgmr.msra.gmra.mrb[18].mxu1 %vm188_vm2, %v1088_v32 }
 0x6c0   :  { %2321 = vmatprep.mubr.msk.f32.mxu1 %vm2543_vm1, %v2542_v36 }
 0x6de   :  { %v673_v33 = vpop.xlane.xlu1 %672 }
 0x6df   :  { %v677_v34 = vsub.f32 %v589_v14, %v673_v33 }
 0x6e1   :  { %v679_v35 = vmul.f32 1.442695, %v677_v34 }
 0x6e3   :  { %2486 = vpow2.f32 %v679_v35 }
 0x6ed   :  { %v2487_v37 = vpop.eup %2486 }
 0x6ee   :  { %v683_v38 = vsel %vm188_vm2, %v2487_v37, 0.0 }
 0x6ef   :  { %684 = vadd.xlane.f32.xlu0 %v683_v38 }
 0x705   :  { %693 = vrot.lane.b32.xlu0 %v2677_v41, %s2549_s26 }
 0x709   :  { %1263 = vrot.lane.b32.xlu0 %v2675_v39, %s2551_s28 }
 0x70d   :  { %1426 = vrot.lane.b32.xlu0 %v2677_v41, %s2552_s0 }
 0x711   :  { %1504 = vrot.lane.b32.xlu0 %v2675_v39, %s2552_s0 }
 0x715   :  { %1424 = vrot.lane.b32.xlu0 %v2677_v41, %s2553_s29 }
 0x77c   :  { %v685_v40 = vpop.xlane.xlu0 %684 }
 0x77d   :  { %2488 = vrcp.f32 %v685_v40 }
 0x780   :  { %v694_v42 = vpop.permute.xlu0 %693 }
 0x781   :  { %2285 = vmatpush3.msra.mxu0 %v694_v42 }
 0x782   :  { %2294 = vmatprep.subr.mxu0 %v2137_v54 }
 0x784   :  { %v1264_v43 = vpop.permute.xlu0 %1263 }
 0x785   :  { %2320 = vmatpush3.msra.mxu1 %v1264_v43 }
 0x786   :  { %2329 = vmatprep.subr.mxu1 %v2542_v36 }
 0x787   :  { %v2489_v44 = vpop.eup %2488 }
 0x788   :  { %v691_v45 = vmul.f32 %v2489_v44, %v2487_v37  ;;  %v1427_v11 = vpop.permute.xlu0 %1426 }
 0x78a   :  { %2287 = vmatmul.mubr.msk.f32.vlgmr.msra.gmra.mrb[0].mxu0 %vm188_vm2, %v691_v45  ;;  %v841_v46 = vpop.f32.mrb[14].mxu1 }
 0x78b   :  { %v2293_v47 = vpop.f32.mrb[15].mxu1  ;;  %2295 = vmatpush3.msra.mxu0 %v2137_v54 }
 0x78c   :  { %2299 = vmatprep.subr.mxu0 %v514_v55  ;;  %v1505_v14 = vpop.permute.xlu0 %1504  ;;  %v2157_v47 = vld [vmem:[%s2931_s5 + $0x18] sm:$0xff] }
 0x78e   :  { %v1083_v48 = vpop.f32.mrb[16].mxu1 }
 0x78f   :  { %v2308_v49 = vpop.f32.mrb[17].mxu1  ;;  %v1165_v50 = vsel %vm188_vm2, %v1083_v48, -inf }
 0x790   :  { %1166 = vmax.xlane.f32.xlu1 %v1165_v50  ;;  %v1425_v16 = vpop.permute.xlu0 %1424 }
 0x792   :  { %v1161_v51 = vpop.f32.mrb[18].mxu1 }
 0x793   :  { %v2313_v52 = vpop.f32.mrb[19].mxu1  ;;  %v1168_v53 = vsel %vm188_vm2, %v1161_v51, -inf }
 0x794   :  { %1169 = vmax.xlane.f32.xlu1 %v1168_v53  ;;  %v2160_v52 = vld [vmem:[%s2932_s6] ss:$0 sm:$0xff] }
 0x81d   :  { %v1167_v56 = vpop.xlane.xlu1 %1166 }
 0x81e   :  { %v1171_v57 = vsub.f32 %v1083_v48, %v1167_v56 }
 0x820   :  { %v1173_v58 = vmul.f32 1.442695, %v1171_v57 }
 0x821   :  { %v1170_v59 = vpop.xlane.xlu1 %1169 }
 0x822   :  { %2490 = vpow2.f32 %v1173_v58  ;;  %v1172_v60 = vsub.f32 %v1161_v51, %v1170_v59 }
 0x824   :  { %v1175_v61 = vmul.f32 1.442695, %v1172_v60 }
 0x826   :  { %2492 = vpow2.f32 %v1175_v61 }
 0x82c   :  { %v2491_v62 = vpop.eup %2490 }
 0x82d   :  { %v1177_v63 = vsel %vm188_vm2, %v2491_v62, 0.0 }
 0x82e   :  { %1178 = vadd.xlane.f32.xlu1 %v1177_v63 }
 0x830   :  { %v2493_v2 = vpop.eup %2492 }
 0x831   :  { %v1180_v3 = vsel %vm188_vm2, %v2493_v2, 0.0 }
 0x832   :  { %1181 = vadd.xlane.f32.xlu1 %v1180_v3 }
 0x843   :  { %1187 = vrot.lane.b32.xlu1 %v2677_v41, %s2551_s28 }
 0x847   :  { %1502 = vrot.lane.b32.xlu1 %v2675_v39, %s2553_s29 }
 0x85d   :  { %v765_v4 = vpop.f32.mrb[0].mxu0 }
 0x85e   :  { %v2288_v5 = vpop.f32.mrb[1].mxu0  ;;  %2296 = vmatprep.mubr.msk.f32.mxu0 %vm188_vm2, %v765_v4 }
 0x85f   :  { %2297 = vmatmul.mubr.msk.f32.vlgmr.msra.gmra.mrb[2].mxu0 %vm188_vm2, %v841_v46 }
 0x860   :  { %2301 = vmatprep.mubr.msk.f32.mxu0 %vm188_vm2, %v2723_v10  ;;  %2300 = vmatpush3.msra.mxu0 %v514_v55 }
 0x861   :  { %2314 = vmatprep.subr.mxu0 %v2542_v36 }
 0x867   :  { %2302 = vmatmul.mubr.msk.f32.vlgmr.msra.gmra.mrb[2].mxu0 %vm188_vm2, %v2725_v12 }
 0x868   :  { %2316 = vmatprep.mubr.msk.f32.mxu0 %vm2543_vm1, %v2542_v36 }
 0x8bb   :  { %v1179_v6 = vpop.xlane.xlu1 %1178 }
 0x8bc   :  { %2494 = vrcp.f32 %v1179_v6  ;;  %v1894_v6 = vld [vmem:[%s2935_s9] sm:$0xff] }
 0x8bf   :  { %v1182_v7 = vpop.xlane.xlu1 %1181 }
 0x8c0   :  { %2496 = vrcp.f32 %v1182_v7  ;;  %v1895_v7 = vld [vmem:[%s2935_s9 + $0x8] sm:$0xff] }
 0x8c3   :  { %v1188_v9 = vpop.permute.xlu1 %1187 }
 0x8c4   :  { %2315 = vmatpush3.msra.mxu0 %v1188_v9  ;;  %v1896_v9 = vld [vmem:[%s2935_s9 + $0x10] sm:$0xff] }
 0x8c5   :  { %2324 = vmatprep.subr.mxu0 %v2148_v8 }
 0x8c6   :  { %v2495_v10 = vpop.eup %2494 }
 0x8c7   :  { %v1185_v13 = vmul.f32 %v2495_v10, %v2491_v62  ;;  %v1503_v21 = vpop.permute.xlu1 %1502 }
 0x8c9   :  { %2317 = vmatmul.mubr.msk.f32.vlgmr.msra.gmra.mrb[4].mxu0 %vm188_vm2, %v1185_v13 }
 0x8ca   :  { %v2497_v12 = vpop.eup %2496  ;;  %2325 = vmatpush3.msra.mxu0 %v2148_v8  ;;  %v2408_v8 = vpack.c.bf16 %v1895_v7, %v1894_v6  ;;  %v2168_v7 = vld [vmem:[%s2938_s12] ss:$0 sm:$0xff] }
 0x8cb   :  { %v1186_v15 = vmul.f32 %v2497_v12, %v2493_v2  ;;  %2334 = vmatprep.subr.mxu0 %v2542_v36 }
 0x8cd   :  { %2322 = vmatmul.mubr.msk.f32.vlgmr.msra.gmra.mrb[20].mxu1 %vm188_vm2, %v1186_v15 }
 0x8ce   :  { %2330 = vmatpush3.xpose.msk.msra.mxu1 %vm188_vm2, %v1427_v11  ;;  %2331 = vmatprep.mubr.msk.f32.mxu1 %vm2543_vm1, %v2542_v36  ;;  %v1897_v11 = vld [vmem:[%s2935_s9 + $0x18] sm:$0xff] }
 0x8cf   :  { %2339 = vmatprep.subr.mxu1 %v2542_v36  ;;  %v2412_v10 = vpack.c.bf16 %v1897_v11, %v1896_v9 }
 0x8d1   :  { %2332 = vmatmul.mubr.msk.f32.vlgmr.msra.gmra.mrb[22].mxu1 %vm188_vm2, %v1425_v16 }
 0x8d2   :  { %2341 = vmatprep.mubr.msk.f32.mxu1 %vm2543_vm1, %v2542_v36 }
 0x99c   :  { %v1259_v17 = vpop.f32.mrb[4].mxu0 }
 0x99d   :  { %v2318_v18 = vpop.f32.mrb[5].mxu0  ;;  %2326 = vmatprep.mubr.msk.f32.mxu0 %vm188_vm2, %v1259_v17 }
 0x9a0   :  { %v1335_v19 = vpop.f32.mrb[20].mxu1 }
 0x9a1   :  { %v2323_v20 = vpop.f32.mrb[21].mxu1  ;;  %2327 = vmatmul.mubr.msk.f32.vlgmr.msra.gmra.mrb[2].mxu0 %vm188_vm2, %v1335_v19  ;;  %v2161_v19 = vld [vmem:[%s2933_s7] ss:$0 sm:$0xff] }
 0x9a2   :  { %2335 = vmatpush3.xpose.msk.msra.mxu0 %vm188_vm2, %v1505_v14  ;;  %2336 = vmatprep.mubr.msk.f32.mxu0 %vm2543_vm1, %v2542_v36 }
 0x9a3   :  { %2344 = vmatprep.subr.mxu0 %v2542_v36 }
 0x9a4   :  { %v1498_v22 = vpop.f32.mrb[22].mxu1 }
 0x9a5   :  { %v2333_v23 = vpop.f32.mrb[23].mxu1  ;;  %2337 = vmatmul.mubr.msk.f32.vlgmr.msra.gmra.mrb[6].mxu0 %vm188_vm2, %v1503_v21  ;;  %v1580_v24 = vsel %vm188_vm2, %v1498_v22, -inf }
 0x9a6   :  { %1581 = vmax.xlane.f32.xlu0 %v1580_v24  ;;  %2346 = vmatprep.mubr.msk.f32.mxu0 %vm2543_vm1, %v2542_v36  ;;  %v2162_v23 = vld [vmem:[%s2934_s8] ss:$0 sm:$0xff] }
 0xa33   :  { %v1582_v25 = vpop.xlane.xlu0 %1581 }
 0xa34   :  { %v1586_v26 = vsub.f32 %v1498_v22, %v1582_v25 }
 0xa36   :  { %v1588_v27 = vmul.f32 1.442695, %v1586_v26 }
 0xa38   :  { %2498 = vpow2.f32 %v1588_v27 }
 0xa42   :  { %v2499_v28 = vpop.eup %2498 }
 0xa43   :  { %v1592_v29 = vsel %vm188_vm2, %v2499_v28, 0.0 }
 0xa44   :  { %1593 = vadd.xlane.f32.xlu0 %v1592_v29  ;;  %v2003_v29 = vld [vmem:[%s2937_s11 + $0x8] sm:$0xff] }
 0xa78   :  { %v1576_v30 = vpop.f32.mrb[6].mxu0 }
 0xa79   :  { %v2338_v31 = vpop.f32.mrb[7].mxu0  ;;  %v1583_v32 = vsel %vm188_vm2, %v1576_v30, -inf }
 0xa7a   :  { %1584 = vmax.xlane.f32.xlu1 %v1583_v32  ;;  %v2004_v31 = vld [vmem:[%s2937_s11 + $0x10] sm:$0xff]  ;;  %v2005_v32 = vld [vmem:[%s2937_s11 + $0x18] sm:$0xff] }
 0xa8b   :  { %1678 = vrot.lane.b32.xlu1 %v2675_v39, %s2554_s19 }
 0xad1   :  { %v1594_v40 = vpop.xlane.xlu0 %1593 }
 0xb07   :  { %v1585_v33 = vpop.xlane.xlu1 %1584 }
 0xb08   :  { %v1587_v34 = vsub.f32 %v1576_v30, %v1585_v33  ;;  %v2420_v33 = vpack.c.bf16 %v2005_v32, %v2004_v31 }
 0xb0a   :  { %v1590_v35 = vmul.f32 1.442695, %v1587_v34  ;;  %v2006_v34 = vld [vmem:[%s2937_s11 + $0x20] sm:$0xff] }
 0xb0b   :  { %v1679_v36 = vpop.permute.xlu1 %1678 }
 0xb0c   :  { %2500 = vpow2.f32 %v1590_v35  ;;  %2345 = vmatpush3.msra.mxu0 %v1679_v36  ;;  %v2007_v35 = vld [vmem:[%s2937_s11 + $0x28] sm:$0xff] }
 0xb0d   :  { %2502 = vrcp.f32 %v1594_v40  ;;  %2349 = vmatprep.subr.mxu0 %v2157_v47  ;;  %v2424_v36 = vpack.c.bf16 %v2007_v35, %v2006_v34 }
 0xb16   :  { %v2501_v37 = vpop.eup %2500 }
 0xb17   :  { %v1595_v38 = vsel %vm188_vm2, %v2501_v37, 0.0  ;;  %v2503_v43 = vpop.eup %2502 }
 0xb18   :  { %1596 = vadd.xlane.f32.xlu0 %v1595_v38  ;;  %v1600_v44 = vmul.f32 %v2503_v43, %v2499_v28  ;;  %v2002_v28 = vld [vmem:[%s2937_s11] sm:$0xff]  ;;  %v2009_v38 = vld [vmem:[%s2937_s11 + $0x38] sm:$0xff]  ;;  %v2011_v43 = vld [vmem:[%s2937_s11 + $0x48] sm:$0xff] }
 0xb19   :  { %v2416_v30 = vpack.c.bf16 %v2003_v29, %v2002_v28 }
 0xb2e   :  { %1602 = vrot.lane.b32.xlu0 %v2677_v41, %s2554_s19 }
 0xba5   :  { %v1597_v42 = vpop.xlane.xlu0 %1596 }
 0xba6   :  { %2504 = vrcp.f32 %v1597_v42  ;;  %v2010_v42 = vld [vmem:[%s2937_s11 + $0x40] sm:$0xff] }
 0xba9   :  { %v1603_v45 = vpop.permute.xlu0 %1602 }
 0xbaa   :  { %2340 = vmatpush3.msra.mxu1 %v1603_v45  ;;  %v2012_v45 = vld [vmem:[%s2937_s11 + $0x50] sm:$0xff] }
 0xbab   :  { %2342 = vmatmul.mubr.msk.f32.vlgmr.msra.gmra.mrb[24].mxu1 %vm188_vm2, %v1600_v44  ;;  %2409 = vmatprep.subr.bf16.mxu1 %v2408_v8  ;;  %v2432_v44 = vpack.c.bf16 %v2011_v43, %v2010_v42 }
 0xbac   :  { %2411 = vmatpush3.bf16.msra.mxu1 %v2408_v8 }
 0xbad   :  { %2413 = vmatprep.subr.bf16.mxu1 %v2412_v10 }
 0xbb0   :  { %v2505_v39 = vpop.eup %2504  ;;  %2415 = vmatpush3.bf16.msra.mxu1 %v2412_v10 }
 0xbb1   :  { %v1601_v46 = vmul.f32 %v2505_v39, %v2501_v37  ;;  %v2008_v37 = vld [vmem:[%s2937_s11 + $0x30] sm:$0xff]  ;;  %v2013_v39 = vld [vmem:[%s2937_s11 + $0x58] sm:$0xff] }
 0xbb2   :  { %v2428_v40 = vpack.c.bf16 %v2009_v38, %v2008_v37 }
 0xbb3   :  { %2347 = vmatmul.mubr.msk.f32.vlgmr.msra.gmra.mrb[8].mxu0 %vm188_vm2, %v1601_v46  ;;  %v2436_v46 = vpack.c.bf16 %v2013_v39, %v2012_v45 }
 0xbb4   :  { %2350 = vmatpush3.msra.mxu0 %v2157_v47  ;;  %v2014_v47 = vld [vmem:[%s2937_s11 + $0x60] sm:$0xff] }
 0xbb5   :  { %2417 = vmatprep.subr.bf16.mxu0 %v2416_v30 }
 0xc7e   :  { %v1674_v41 = vpop.f32.mrb[24].mxu1 }
 0xc7f   :  { %v2343_v48 = vpop.f32.mrb[25].mxu1  ;;  %2351 = vmatprep.mubr.msk.f32.mxu0 %vm188_vm2, %v1674_v41  ;;  %v2015_v41 = vld [vmem:[%s2937_s11 + $0x68] sm:$0xff] }
 0xc80   :  { %v2440_v48 = vpack.c.bf16 %v2015_v41, %v2014_v47 }
 0xc86   :  { %v1750_v49 = vpop.f32.mrb[8].mxu0 }
 0xc87   :  { %v2348_v50 = vpop.f32.mrb[9].mxu0  ;;  %2352 = vmatmul.mubr.msk.f32.vlgmr.msra.gmra.mrb[2].mxu0 %vm188_vm2, %v1750_v49  ;;  %v2016_v49 = vld [vmem:[%s2937_s11 + $0x70] sm:$0xff] }
 0xc88   :  { %2419 = vmatpush3.bf16.msra.mxu0 %v2416_v30  ;;  %v2017_v50 = vld [vmem:[%s2937_s11 + $0x78] sm:$0xff] }
 0xc89   :  { %2421 = vmatprep.subr.bf16.mxu0 %v2420_v33 }
 0xc8c   :  { %2423 = vmatpush3.bf16.msra.mxu0 %v2420_v33 }
 0xc8d   :  { %2425 = vmatprep.subr.bf16.mxu0 %v2424_v36 }
 0xc90   :  { %2427 = vmatpush3.bf16.msra.mxu0 %v2424_v36 }
 0xc91   :  { %2429 = vmatprep.subr.bf16.mxu0 %v2428_v40 }
 0xc94   :  { %2431 = vmatpush3.bf16.msra.mxu0 %v2428_v40 }
 0xc95   :  { %2433 = vmatprep.subr.bf16.mxu0 %v2432_v44 }
 0xc98   :  { %2435 = vmatpush3.bf16.msra.mxu0 %v2432_v44 }
 0xc99   :  { %2437 = vmatprep.subr.bf16.mxu0 %v2436_v46 }
 0xc9c   :  { %2439 = vmatpush3.bf16.msra.mxu0 %v2436_v46 }
 0xc9d   :  { %2441 = vmatprep.subr.bf16.mxu0 %v2440_v48 }
 0xca0   :  { %2443 = vmatpush3.bf16.msra.mxu0 %v2440_v48 }
 0xd5a   :  { %v2353_v51 = vpop.f32.mrb[2].mxu0 }
 0xd5b   :  { %v1840_v53 = vadd.f32 %v2353_v51, %v2636_v1  ;;  %v1828_v54 = vpop.f32.mrb[3].mxu0  ;;  %v2444_v51 = vpack.c.bf16 %v2017_v50, %v2016_v49 }
 0xd5c   :  { %v1839_v55 = vadd.f32 %v1828_v54, %v2631_v0 }
 0xd5d   :  { %v2824_v56 = vadd.f32 %v2160_v52, %v1840_v53  ;;  %2445 = vmatprep.subr.bf16.mxu0 %v2444_v51 }
 0xd5e   :  { %v2826_v57 = vadd.f32 %v2160_v52, %v1839_v55  ;;  %2447 = vmatpush3.bf16.msra.mxu0 %v2444_v51  ;;  %v2163_v52 = vld [vmem:[%s2936_s10] ss:$0 sm:$0xff] }
 0xd5f   :  { %v1855_v58 = vsel %vm49_vm0, %v2824_v56, 0.0 }
 0xd60   :  { %1856 = vadd.xlane.f32.xlu0 %v1855_v58  ;;  %v1852_v59 = vsel %vm49_vm0, %v2826_v57, 0.0 }
 0xd61   :  { %1853 = vadd.xlane.f32.xlu1 %v1852_v59 }
 0xded   :  { %v1857_v60 = vpop.xlane.xlu0 %1856 }
 0xdee   :  { %v1859_v61 = vmul.f32 0.03125, %v1857_v60  ;;  %v1854_v62 = vpop.xlane.xlu1 %1853 }
 0xdef   :  { %v1858_v63 = vmul.f32 0.03125, %v1854_v62 }
 0xdf0   :  { %v1861_v1 = vsub.f32 %v2824_v56, %v1859_v61 }
 0xdf1   :  { %v1860_v0 = vsub.f32 %v2826_v57, %v1858_v63 }
 0xdf2   :  { %v1863_v2 = vmul.f32 %v1861_v1, %v1861_v1 }
 0xdf3   :  { %v1862_v3 = vmul.f32 %v1860_v0, %v1860_v0 }
 0xdf4   :  { %v1867_v4 = vsel %vm49_vm0, %v1863_v2, 0.0 }
 0xdf5   :  { %1868 = vadd.xlane.f32.xlu1 %v1867_v4  ;;  %v1864_v5 = vsel %vm49_vm0, %v1862_v3, 0.0 }
 0xdf6   :  { %1865 = vadd.xlane.f32.xlu0 %v1864_v5 }
 0xe82   :  { %v1869_v13 = vpop.xlane.xlu1 %1868 }
 0xe83   :  { %v1871_v12 = vmul.f32 0.03125, %v1869_v13  ;;  %v1866_v14 = vpop.xlane.xlu0 %1865 }
 0xe84   :  { %v1870_v15 = vmul.f32 0.03125, %v1866_v14 }
 0xe85   :  { %v1873_v16 = vadd.f32 1e-05, %v1871_v12 }
 0xe86   :  { %v1872_v17 = vadd.f32 1e-05, %v1870_v15 }
 0xe87   :  { %2506 = vrsqrt.f32 %v1873_v16 }
 0xe88   :  { %2508 = vrsqrt.f32 %v1872_v17 }
 0xe91   :  { %v2507_v18 = vpop.eup %2506 }
 0xe92   :  { %v2509_v20 = vpop.eup %2508  ;;  %v1877_v21 = vmul.f32 %v2507_v18, %v1861_v1 }
 0xe93   :  { %v1876_v22 = vmul.f32 %v2509_v20, %v1860_v0 }
 0xe94   :  { %v1885_v24 = vmul.f32 %v2161_v19, %v1877_v21 }
 0xe95   :  { %v1884_v25 = vmul.f32 %v2161_v19, %v1876_v22 }
 0xe96   :  { %v1893_v27 = vadd.f32 %v2162_v23, %v1885_v24 }
 0xe97   :  { %v1892_v26 = vadd.f32 %v2162_v23, %v1884_v25 }
 0xe99   :  { %2362 = vmatprep.mubr.msk.f32.mxu1 %vm49_vm0, %v1892_v26 }
 0xe9a   :  { %2363 = vmatmul.mubr.msk.f32.vlgmr.msra.gmra.mrb[26].mxu1 %vm49_vm0, %v1893_v27 }
 0xf6d   :  { %v2364_v53 = vpop.f32.mrb[26].mxu1 }
 0xf6e   :  { %v1983_v54 = vadd.f32 %v2364_v53, %v2163_v52  ;;  %v1977_v55 = vpop.f32.mrb[27].mxu1 }
 0xf6f   :  { %v1978_v58 = vadd.f32 %v2163_v52, %v1977_v55 }
 0xf70   :  { %v2167_v59 = vmul.f32 -1.702, %v1983_v54 }
 0xf71   :  { %v2166_v60 = vmul.f32 -1.702, %v1978_v58 }
 0xf72   :  { %v1992_v61 = vmul.f32 1.442695, %v2167_v59 }
 0xf73   :  { %v1990_v62 = vmul.f32 1.442695, %v2166_v60 }
 0xf74   :  { %2510 = vpow2.f32 %v1992_v61 }
 0xf75   :  { %2512 = vpow2.f32 %v1990_v62 }
 0xf7e   :  { %v2511_v63 = vpop.eup %2510 }
 0xf7f   :  { %v2513_v1 = vpop.eup %2512  ;;  %v1995_v0 = vadd.f32 1.0, %v2511_v63 }
 0xf80   :  { %v1994_v2 = vadd.f32 1.0, %v2513_v1 }
 0xf81   :  { %2514 = vrcp.f32 %v1995_v0 }
 0xf82   :  { %2516 = vrcp.f32 %v1994_v2 }
 0xf8b   :  { %v2515_v3 = vpop.eup %2514 }
 0xf8c   :  { %v2517_v4 = vpop.eup %2516  ;;  %v2001_v6 = vmul.f32 %v2515_v3, %v1983_v54 }
 0xf8d   :  { %v2000_v5 = vmul.f32 %v2517_v4, %v1978_v58 }
 0xf8f   :  { %2397 = vmatprep.mubr.f32.mxu0 %v2000_v5 }
 0xf90   :  { %2398 = vmatmul.mubr.f32.vlgmr.msra.gmra.mrb[10].mxu0 %v2001_v6 }
0x1063   :  { %v2399_v8 = vpop.f32.mrb[10].mxu0 }
0x1064   :  { %v2097_v9 = vadd.f32 %v2399_v8, %v2168_v7  ;;  %v2091_v11 = vpop.f32.mrb[11].mxu0 }
0x1065   :  { %v2092_v10 = vadd.f32 %v2168_v7, %v2091_v11 }
0x1066   :  { %v2101_v13 = vadd.f32 %v2097_v9, %v2824_v56 }
0x1067   :  { %v2100_v12 = vadd.f32 %v2092_v10, %v2826_v57 }
0x1068   :  { %2103 = vst.msk [vmem:[#allocation2 + $0x8] sm:$0xff] %vm49_vm0, %v2101_v13 }
0x1069   :  { %2102 = vst.msk [vmem:[#allocation2] sm:$0xff] %vm49_vm0, %v2100_v12 }
0x106a   :  { %2529 = shalt.err (!%p2526_p4)
}
0x106b   :  { %s2530_s20 = scalar_lea.hbm %s2939_s13, 256 }
0x106c   :  { %p2531_p5 = scmp.ne.s32.totalorder %s2939_s13, %s2530_s20  ;;  %p2534_p6 = scmp.lt.u32.totalorder %s2530_s20, %s2939_s13 }
0x106e   :  { %p2536_p7 = pnand %p2534_p6, %p2531_p5 }
0x1070   :  { %2539 = shalt.err (!%p2536_p7)
}
0x1071   :  { %s2556_s6 = smov 128   ;;  %s2557_s2 = smov 8  }
0x1072   :  { %2115 = dma.vmem_to_hbm [thread:$0]  %s2110_s17, 256, %s2939_s13, [#allocation3], %s2556_s6, %s2556_s6, %s2557_s2  }
0x1073   :  { %2540 = dma.done.wait [#allocation3], 256  }
0x1074   :  { %2541 = vsyncadd [#allocation3], 4294967040 }
0x1075   :  { %2119 = vsyncpa [#allocation3], 1 }

</bundles_post_ra>
